<compile_context>
chip_gen: v6e
topology: v6e:2x2x1
jax: 0.10.0
libtpu: 0.0.40
codegen_flags: <defaults>
</compile_context>

<pallas_src>
import jax
import jax.numpy as jnp
from jax.experimental import pallas as pl
from jax.experimental.pallas import tpu as pltpu

EPS = 1e-5
LANE = 128
SUBLANE = 8


def _round_up(x, m):
    return ((x + m - 1) // m) * m


def _label_encoder_kernel(x_ref, w_ref, p_ref, o_ref):
    """One pass: Linear + BatchNorm application.

    p_ref rows: 0 = bias, 1 = scale (gamma * inv_std), 2 = shift (beta - mean * scale).
    """
    x = x_ref[...].astype(jnp.float32)                    # labels.float() done in-kernel
    h = jnp.dot(x, w_ref[...], preferred_element_type=jnp.float32)
    o_ref[...] = ((h + p_ref[0:1, :]) * p_ref[1:2, :] + p_ref[2:3, :]).astype(o_ref.dtype)


def _choose_tile_out(out_p):
    # Full-width tile whenever it comfortably fits (it does up to ~2K even on v7x's budget),
    # otherwise the largest 128-multiple divisor <= 1024 (never collapses to 128 needlessly).
    if out_p <= 2048:
        return out_p
    for cand in (1024, 512, 256, 128):
        if out_p % cand == 0:
            return cand
    return LANE  # unreachable: out_p is a multiple of 128


def _choose_tile_n(n, max_tile=1024):
    # Batch tile <= max_tile rows with at most a handful of padding rows.
    n_tiles = -(-n // max_tile)
    return _round_up(-(-n // n_tiles), SUBLANE)


def label_encoder(labels, w, b, gamma, beta):
    """labels: (N, label_dim) any float/int dtype; w: (out_dim, label_dim) PyTorch layout;
    b, gamma, beta: (out_dim,).  Returns (N, out_dim) float32 =
    BatchNorm1d(Linear(labels.float())) in training mode (batch stats, biased variance)."""
    n, label_dim = labels.shape
    out_dim = w.shape[0]

    # ---- Label-space batch statistics (cheap XLA reductions; see header comment) ---------
    xf = labels.astype(jnp.float32)
    inv_n = jnp.float32(1.0 / n)
    mu_x = jnp.sum(xf, axis=0) * inv_n                                   # (label_dim,)
    gram = jnp.dot(xf.T, xf, preferred_element_type=jnp.float32) * inv_n  # E[x x^T]
    cov = gram - jnp.outer(mu_x, mu_x)                                   # biased cov(x)

    wf = w.astype(jnp.float32)
    bf = b.astype(jnp.float32)
    mean = wf @ mu_x + bf                                                # batch mean of h
    var = jnp.maximum(jnp.sum((wf @ cov) * wf, axis=1), 0.0)             # biased var of h
    scale = gamma.astype(jnp.float32) * jax.lax.rsqrt(var + EPS)
    shift = beta.astype(jnp.float32) - mean * scale

    # ---- Tiling ---------------------------------------------------------------------------
    out_p = _round_up(out_dim, LANE)          # lane-dense, unmasked stores
    tile_out = _choose_tile_out(out_p)
    tile_n = _choose_tile_n(n)
    n_p = _round_up(n, tile_n)                # <= a few rows of padding

    # Padded rows are zeros; statistics above use the unpadded x, so no masking is needed
    # (padded output rows are simply sliced off).
    x = jnp.pad(labels, ((0, n_p - n), (0, 0)))          # native dtype, cast in-kernel

    # Weight pre-transposed to (label_dim, out_p); zero-padded columns -> padded output is 0.
    w_t = jnp.pad(jnp.transpose(wf), ((0, 0), (0, out_p - out_dim)))

    # bias / scale / shift packed into a single (8, out_p) f32 operand (one small DMA).
    params = jnp.zeros((SUBLANE, out_p), jnp.float32)
    params = params.at[0, :out_dim].set(bf)
    params = params.at[1, :out_dim].set(scale)
    params = params.at[2, :out_dim].set(shift)

    n_tiles = n_p // tile_n
    o_tiles = out_p // tile_out

    out = pl.pallas_call(
        _label_encoder_kernel,
        out_shape=jax.ShapeDtypeStruct((n_p, out_p), jnp.float32),
        grid=(n_tiles, o_tiles),
        in_specs=[
            pl.BlockSpec((tile_n, label_dim), lambda i, j: (i, 0)),
            pl.BlockSpec((label_dim, tile_out), lambda i, j: (0, j)),
            pl.BlockSpec((SUBLANE, tile_out), lambda i, j: (0, j)),
        ],
        out_specs=pl.BlockSpec((tile_n, tile_out), lambda i, j: (i, j)),
        compiler_params=pltpu.CompilerParams(
            # No cross-step state -> both axes parallel (v7x megacore can split either one).
            dimension_semantics=("parallel", "parallel"),
            vmem_limit_bytes=32 * 1024 * 1024,   # consistent guardrail for v7x's 64 MiB VMEM
        ),
    )(x, w_t, params)

    return out[:n, :out_dim]


def _reference(labels, w, b, gamma, beta):
    """Pure-JAX reference (PyTorch training-mode BatchNorm1d semantics)."""
    x = labels.astype(jnp.float32)
    h = x @ w.astype(jnp.float32).T + b
    mean = jnp.mean(h, axis=0, keepdims=True)
    var = jnp.mean((h - mean) ** 2, axis=0, keepdims=True)   # biased variance
    return (h - mean) / jnp.sqrt(var + EPS) * gamma + beta


def _check(labels, w, b, gamma, beta, tol=2e-3):
    out = jax.block_until_ready(label_encoder(labels, w, b, gamma, beta))
    ref = _reference(labels, w, b, gamma, beta)
    assert out.shape == ref.shape
    err = jnp.max(jnp.abs(out - ref))
    assert jnp.allclose(out, ref, atol=tol, rtol=tol), f"mismatch vs reference: {err}"
    return out


if __name__ == "__main__":
    key = jax.random.PRNGKey(0)
    (k_idx, k_w, k_b, k_g, k_be,
     k_x2, k_w2, k_b2, k_g2, k_be2) = jax.random.split(key, 10)

    # Small shapes consistent with the module: batch=8, label_dim=16, out_dim=32, one-hot.
    batch, label_dim, out_dim = 8, 16, 32
    labels = jax.nn.one_hot(jax.random.randint(k_idx, (batch,), 0, label_dim),
                            label_dim, dtype=jnp.float32)
    w = 0.1 * jax.random.normal(k_w, (out_dim, label_dim), jnp.float32)
    b = 0.01 * jax.random.normal(k_b, (out_dim,), jnp.float32)
    gamma = 1.0 + 0.1 * jax.random.normal(k_g, (out_dim,), jnp.float32)
    beta = 0.1 * jax.random.normal(k_be, (out_dim,), jnp.float32)
    _check(labels, w, b, gamma, beta)

    # Larger case exercising the new tiling: 700 rows -> one 704-row tile (4 padded rows),
    # out_dim=600 -> a single 640-wide lane-dense tile; general float labels (f32 matmul).
    batch2, out_dim2 = 700, 600
    labels2 = jax.random.normal(k_x2, (batch2, label_dim), jnp.float32)
    w2 = 0.1 * jax.random.normal(k_w2, (out_dim2, label_dim), jnp.float32)
    b2 = 0.01 * jax.random.normal(k_b2, (out_dim2,), jnp.float32)
    gamma2 = 1.0 + 0.1 * jax.random.normal(k_g2, (out_dim2,), jnp.float32)
    beta2 = 0.1 * jax.random.normal(k_be2, (out_dim2,), jnp.float32)
    _check(labels2, w2, b2, gamma2, beta2)

    print("KERNEL_OK")
</pallas_src>

<mosaic_0001>
module attributes {stable_mosaic.version = 11 : i64} {
  func.func @_label_encoder_kernel(%arg0: i32, %arg1: i32, %arg2: memref<8x16xf32, #tpu.memory_space<vmem>>, %arg3: memref<16x128xf32, #tpu.memory_space<vmem>>, %arg4: memref<8x128xf32, #tpu.memory_space<vmem>>, %arg5: memref<8x128xf32, #tpu.memory_space<vmem>>) attributes {dimension_semantics = [#tpu.dimension_semantics<parallel>, #tpu.dimension_semantics<parallel>], iteration_bounds = array<i64: 1, 1>, scalar_prefetch = 0 : i64, scratch_operands = 0 : i64, tpu.core_type = #tpu.core_type<tc>, window_params = [{transform_indices = @transform_0, window_bounds = array<i64: 8, 16>}, {transform_indices = @transform_1, window_bounds = array<i64: 16, 128>}, {transform_indices = @transform_2, window_bounds = array<i64: 8, 128>}, {transform_indices = @transform_3, window_bounds = array<i64: 8, 128>}]} {
    %c0 = arith.constant 0 : index
    %c0_0 = arith.constant 0 : index
    %0 = vector.load %arg2[%c0, %c0_0] : memref<8x16xf32, #tpu.memory_space<vmem>>, vector<8x16xf32>
    %c0_1 = arith.constant 0 : index
    %c0_2 = arith.constant 0 : index
    %1 = vector.load %arg3[%c0_1, %c0_2] : memref<16x128xf32, #tpu.memory_space<vmem>>, vector<16x128xf32>
    %cst = arith.constant dense<0.000000e+00> : vector<8x128xf32>
    %2 = tpu.matmul %0, %1, %cst {dimension_numbers = #tpu.dot_dimension_numbers<[1], [0], [0], [1], [0, 0, 1, 1], [], []>} : vector<8x16xf32>, vector<16x128xf32>, vector<8x128xf32> -> vector<8x128xf32>
    %c0_3 = arith.constant 0 : index
    %c0_4 = arith.constant 0 : index
    %3 = vector.load %arg4[%c0_3, %c0_4] : memref<8x128xf32, #tpu.memory_space<vmem>>, vector<1x128xf32>
    %4 = vector.broadcast %3 : vector<1x128xf32> to vector<8x128xf32>
    %5 = arith.addf %2, %4 : vector<8x128xf32>
    %c1 = arith.constant 1 : index
    %c0_5 = arith.constant 0 : index
    %6 = vector.load %arg4[%c1, %c0_5] : memref<8x128xf32, #tpu.memory_space<vmem>>, vector<1x128xf32>
    %7 = vector.broadcast %6 : vector<1x128xf32> to vector<8x128xf32>
    %8 = arith.mulf %5, %7 : vector<8x128xf32>
    %c2 = arith.constant 2 : index
    %c0_6 = arith.constant 0 : index
    %9 = vector.load %arg4[%c2, %c0_6] : memref<8x128xf32, #tpu.memory_space<vmem>>, vector<1x128xf32>
    %10 = vector.broadcast %9 : vector<1x128xf32> to vector<8x128xf32>
    %11 = arith.addf %8, %10 : vector<8x128xf32>
    %c0_7 = arith.constant 0 : index
    %c0_8 = arith.constant 0 : index
    %12 = vector.load %arg5[%c0_7, %c0_8] : memref<8x128xf32, #tpu.memory_space<vmem>>, vector<8x128xf32>
    tpu.vector_store %arg5[%c0_7, %c0_8], %11 {strides = array<i32>} : memref<8x128xf32, #tpu.memory_space<vmem>>, vector<8x128xf32>,
    return
  }
  func.func @transform_0(%arg0: i32, %arg1: i32) -> (i32, i32) {
    %c0_i32 = arith.constant 0 : i32
    %c0_i32_0 = arith.constant 0 : i32
    return %arg0, %c0_i32 : i32, i32
  }
  func.func @transform_1(%arg0: i32, %arg1: i32) -> (i32, i32) {
    %c0_i32 = arith.constant 0 : i32
    %c0_i32_0 = arith.constant 0 : i32
    return %c0_i32, %arg1 : i32, i32
  }
  func.func @transform_2(%arg0: i32, %arg1: i32) -> (i32, i32) {
    %c0_i32 = arith.constant 0 : i32
    %c0_i32_0 = arith.constant 0 : i32
    return %c0_i32, %arg1 : i32, i32
  }
  func.func @transform_3(%arg0: i32, %arg1: i32) -> (i32, i32) {
    %c0_i32 = arith.constant 0 : i32
    return %arg0, %arg1 : i32, i32
  }
}

</mosaic_0001>

<bundles_post_ra>
// kernel: tpu_custom_call.1
= control target key start
LH: loop header
LB: loop body
LE: loop exit
PB: predicated region body
PF: predicated region fallthrough
CT: control target
= control target key end

     0   :  { %8 = vsyncpa [#allocation3], 0  ;;  %s311_s0 = inlined_call_operand.hbm [shape: f32[8,16], index: 0, kind: input, shape index: {}]   ;;  %s312_s1 = inlined_call_operand.hbm [shape: f32[16,128], index: 1, kind: input, shape index: {}]   ;;  %s313_s2 = inlined_call_operand.hbm [shape: f32[8,128], index: 2, kind: input, shape index: {}]   ;;  %s314_s3 = inlined_call_operand.hbm [shape: f32[8,128], index: 3, kind: output, shape index: {}]  }
   0x1   :  { %9 = vsyncpa [#allocation6], 0 }
   0x2   :  { %10 = vsyncpa [#allocation4], 0  ;;  %s271_s12 = smov [#allocation5]  }
   0x3   :  { %s26_s13 = sshll.u32 %s271_s12, 4  ;;  %s27_s13 = int_to_ptr.vmem [resolvable:$true] %s26_s13 }
   0x4   :  { %s193_s14 = scalar_lea.vmem %s27_s13, 256  ;;  %p198_p1 = scmp.lt.s32.totalorder %s27_s13, %s27_s13 }
   0x5   :  { %p194_p0 = scmp.ne.s32.totalorder %s27_s13, %s193_s14  ;;  %p199_p2 = scmp.lt.s32.totalorder %s193_s14, %s193_s14 }
   0x7   :  { %p200_p3 = por %p199_p2, %p198_p1 }
   0x9   :  { %p201_p4 = pnand %p200_p3, %p194_p0 }
   0xb   :  { %204 = shalt.err (!%p201_p4)
}
   0xc   :  { %s272_s15 = smov 128   ;;  %s273_s16 = smov 8  }
   0xd   :  { %32 = dma.hbm_to_vmem [thread:$0]  %s312_s1, 256, %s27_s13, [#allocation6], %s272_s15, %s272_s15, %s273_s16  }
   0xe   :  { %s274_s19 = smov [#allocation2]   ;;  %s275_s21 = smov [#allocation7]  }
   0xf   :  { %s17_s20 = sshll.u32 %s274_s19, 4  ;;  %s39_s22 = sshll.u32 %s275_s21, 4  ;;  %s18_s20 = int_to_ptr.vmem [resolvable:$true] %s17_s20  ;;  %s40_s22 = int_to_ptr.vmem [resolvable:$true] %s39_s22 }
  0x10   :  { %s213_s23 = scalar_lea.vmem %s18_s20, 128  ;;  %p218_p6 = scmp.lt.s32.totalorder %s18_s20, %s18_s20 }
  0x11   :  { %p214_p5 = scmp.ne.s32.totalorder %s18_s20, %s213_s23  ;;  %p219_p7 = scmp.lt.s32.totalorder %s213_s23, %s213_s23 }
  0x13   :  { %p220_p8 = por %p219_p7, %p218_p6 }
  0x15   :  { %p221_p9 = pnand %p220_p8, %p214_p5 }
  0x17   :  { %224 = shalt.err (!%p221_p9)
}
  0x18   :  { %20 = dma.hbm_to_vmem [thread:$0]  %s311_s0, 128, %s18_s20, [#allocation3]  }
  0x19   :  { %s233_s26 = scalar_lea.vmem %s40_s22, 128  ;;  %p238_p11 = scmp.lt.s32.totalorder %s40_s22, %s40_s22 }
  0x1a   :  { %p234_p10 = scmp.ne.s32.totalorder %s40_s22, %s233_s26  ;;  %p239_p12 = scmp.lt.s32.totalorder %s233_s26, %s233_s26 }
  0x1c   :  { %p240_p13 = por %p239_p12, %p238_p11 }
  0x1e   :  { %p241_p0 = pnand %p240_p13, %p234_p10 }
  0x20   :  { %244 = shalt.err (!%p241_p0)
}
  0x21   :  { %42 = dma.hbm_to_vmem [thread:$0]  %s313_s2, 128, %s40_s22, [#allocation6]  }
  0x22   :  { %265 = dma.done.wait [#allocation3], 128  }
  0x23   :  { %266 = vsyncadd [#allocation3], 4294967168 }
  0x24   :  { %267 = dma.done.wait [#allocation6], 384  }
  0x25   :  { %268 = vsyncadd [#allocation6], 4294966912  ;;  %v276_v0 = vmov 0.0   ;;  %vm277_vm0 = vmmov 0   ;;  %v54_v1 = vld [vmem:[#allocation5 + $0x8] sm:$0xff]  ;;  %v53_v2 = vld [vmem:[#allocation5] sm:$0xff] }
  0x26   :  { %170 = vmatprep.subr.mxu0 %v276_v0  ;;  %174 = vmatprep.mubr.msk.f32.mxu0 %vm277_vm0, %v276_v0  ;;  %v52_v3 = vld [vmem:[#allocation2] sm:$0xff]  ;;  %vm60_vm1 = vcmask 130048   ;;  %v163_v4 = vld [vmem:[#allocation7] ss:$0 sm:$0xff]  ;;  %v165_v6 = vld [vmem:[#allocation7 + $0x1] ss:$0 sm:$0xff] }
  0x27   :  { %171 = vmatpush3.msra.mxu0 %v54_v1  ;;  %v166_v9 = vld [vmem:[#allocation7 + $0x2] ss:$0 sm:$0xff]  ;;  %s278_s0 = smov [#allocation8]  }
  0x28   :  { %172 = vmatprep.subr.mxu0 %v276_v0  ;;  %s153_s2 = sshll.u32 %s278_s0, 4  ;;  %s154_s2 = int_to_ptr.vmem [resolvable:$true] %s153_s2 }
  0x29   :  { %173 = vmatpush3.msra.mxu0 %v53_v2  ;;  %s245_s28 = scalar_lea.vmem %s154_s2, 128  ;;  %p250_p2 = scmp.lt.s32.totalorder %s154_s2, %s154_s2 }
  0x2a   :  { %175 = vmatmul.mubr.msk.f32.vlgmr.msra.gmra.mxu0 %vm60_vm1, %v52_v3  ;;  %p246_p1 = scmp.ne.s32.totalorder %s154_s2, %s245_s28  ;;  %p251_p3 = scmp.lt.s32.totalorder %s245_s28, %s245_s28 }
  0x2c   :  { %p252_p4 = por %p251_p3, %p250_p2 }
  0x2e   :  { %p253_p5 = pnand %p252_p4, %p246_p1 }
  0xea   :  { %v130_v5 = vpop.f32.mrf.mxu0 }
  0xeb   :  { %v131_v7 = vadd.f32 %v163_v4, %v130_v5 }
  0xec   :  { %v176_v8 = vpop.f32.mrf.mxu0 }
  0xed   :  { %v139_v10 = vmul.f32 %v165_v6, %v131_v7 }
  0xef   :  { %v145_v11 = vadd.f32 %v166_v9, %v139_v10 }
  0xf1   :  { %146 = vst [vmem:[#allocation8] sm:$0xff] %v145_v11 }
  0xf2   :  { %256 = shalt.err (!%p253_p5)
}
  0xf3   :  { %156 = dma.vmem_to_hbm [thread:$0]  %s154_s2, 128, %s314_s3, [#allocation4]  }
  0xf4   :  { %269 = dma.done.wait [#allocation4], 128  }
  0xf5   :  { %270 = vsyncadd [#allocation4], 4294967168 }
  0xf6   :  { %160 = vsyncpa [#allocation3], 1 }
  0xf7   :  { %161 = vsyncpa [#allocation6], 1 }
  0xf8   :  { %162 = vsyncpa [#allocation4], 1 }

</bundles_post_ra>
